<compile_context>
chip_gen: v6e
topology: v6e:2x2x1
jax: 0.10.0
libtpu: 0.0.40
codegen_flags: <defaults>
</compile_context>

<pallas_src>
import functools

import jax
import jax.numpy as jnp
import numpy as np
from jax import lax
from jax.experimental import pallas as pl
from jax.experimental.pallas import tpu as pltpu


def _round_up(v, m):
    return (v + m - 1) // m * m


@functools.lru_cache(maxsize=32)
def _dft_bases(N, M, Mp, N_pad):
    """Truncated real-DFT / inverse-DFT bases, built once per shape (f64 host math)."""
    k = np.arange(M, dtype=np.int64)[:, None]
    n = np.arange(N, dtype=np.int64)[None, :]
    # Reduce k*n mod N in exact integer arithmetic before the f64 multiply so the
    # basis stays accurate even for large N.
    ang = (2.0 * np.pi / N) * ((k * n) % N).astype(np.float64)          # (M, N)
    cos_a, sin_a = np.cos(ang), np.sin(ang)

    # Forward basis, mode-major, real/imag fused:
    #   rows [0:Mp)  = Re(e^{-j ang}),  rows [Mp:2Mp) = Im(e^{-j ang});
    # padded modes (m >= M) are zero.
    fwd = np.zeros((2 * Mp, N), dtype=np.float32)
    fwd[:M] = cos_a
    fwd[Mp:Mp + M] = -sin_a

    # Inverse basis (Hermitian reconstruction of a real signal), lane-padded to N_pad.
    special = (np.arange(M) == 0) | ((N % 2 == 0) & (np.arange(M) == N // 2))
    c = np.where(special, 1.0, 2.0)[:, None] / N
    inv = np.zeros((2 * Mp, N_pad), dtype=np.float32)
    inv[:M, :N] = c * cos_a
    inv[Mp:Mp + M, :N] = -c * sin_a
    return jnp.asarray(fwd), jnp.asarray(inv)


def _spectral_conv1d_kernel(x_ref, fwd_ref, inv_ref, wr_ref, wi_ref, o_ref, *,
                            bt, cin, cout, mp):
    """One grid step processes `bt` batch elements.

    x_ref : (bt*cin, N)        fwd_ref: (2*mp, N)       inv_ref: (2*mp, N_pad)
    wr_ref/wi_ref: (mp, cin, cout)                      o_ref  : (bt*cout, N_pad)
    """
    # 1) truncated rfft: real & imag halves fused into a single MXU matmul.
    #    xf[p, b*cin+i] = Re X[b,i,p]   for p < mp
    #                   = Im X[b,i,p-mp] for p >= mp
    xf = lax.dot_general(fwd_ref[...], x_ref[...],
                         dimension_numbers=(((1,), (1,)), ((), ())),
                         preferred_element_type=jnp.float32)             # (2mp, bt*cin)
    xf = xf.reshape(2 * mp, bt, cin)                                      # mode-major
    xr, xi = xf[:mp], xf[mp:]                                             # (mp, bt, cin)

    # 2) per-mode complex channel mixing as mode-batched MXU matmuls:
    #    for each mode m: (bt, cin) @ (cin, cout) -> (bt, cout)
    dn = (((2,), (1,)), ((0,), (0,)))                                     # 'mbi,mio->mbo'
    wr, wi = wr_ref[...], wi_ref[...]
    yr = (lax.dot_general(xr, wr, dn, preferred_element_type=jnp.float32)
          - lax.dot_general(xi, wi, dn, preferred_element_type=jnp.float32))
    yi = (lax.dot_general(xr, wi, dn, preferred_element_type=jnp.float32)
          + lax.dot_general(xi, wr, dn, preferred_element_type=jnp.float32))

    # 3) irfft of the zero-padded half spectrum: one fused matmul with a
    #    lane-dense (N_pad % 128 == 0) output block.
    y = jnp.concatenate([yr, yi], axis=0).reshape(2 * mp, bt * cout)      # (2mp, bt*cout)
    out = lax.dot_general(y, inv_ref[...],
                          dimension_numbers=(((0,), (0,)), ((), ())),
                          preferred_element_type=jnp.float32)             # (bt*cout, N_pad)
    o_ref[...] = out.astype(o_ref.dtype)


def _pick_batch_tile(B, Cin, Cout, N, N_pad, Mp, budget_bytes=24 << 20):
    """Largest batch tile whose working set fits a conservative VMEM budget
    (sized so double-buffered blocks stay well inside v7x's 64 MiB VMEM)."""
    def est_bytes(bt):
        blocks = bt * Cin * N + bt * Cout * N_pad                  # streamed x / out
        consts = 2 * Mp * (N + N_pad) + 2 * Mp * Cin * Cout        # bases + weights
        interm = 2 * Mp * bt * (Cin + 4 * Cout) + bt * Cout * N_pad
        return 4 * (2 * blocks + 2 * consts + interm)              # x2: double buffering

    smallest_ok = B
    for bt in range(B, 0, -1):
        if B % bt:
            continue
        rows_ok = bt == B or ((bt * Cin) % 8 == 0 and (bt * Cout) % 8 == 0)
        if not rows_ok:
            continue
        if est_bytes(bt) <= budget_bytes:
            return bt
        smallest_ok = bt
    # Nothing fits the budget: fall back to the smallest legal tile.
    # TODO(synk): for very large N (M ~ N/2) also tile the DFT bases over N
    # instead of keeping them fully resident in VMEM.
    return smallest_ok


def spectral_conv1d(x, weights_real, weights_imag):
    """Pallas forward of SpectralConv1d.

    x: (B, Cin, N) float32; weights_real/imag: (Cin, Cout, modes1) float32
    (real / imaginary parts of the complex weights1).  Returns (B, Cout, N).
    """
    B, Cin, N = x.shape
    wCin, Cout, M = weights_real.shape
    assert wCin == Cin and M <= N // 2 + 1

    Mp = _round_up(M, 8)           # modes padded to a clean sublane multiple
    N_pad = _round_up(N, 128)      # lane-dense output stores
    fwd, inv = _dft_bases(N, M, Mp, N_pad)

    # Weights -> mode-major (Mp, Cin, Cout): Cout in lanes, zero-padded modes.
    wr = jnp.zeros((Mp, Cin, Cout), jnp.float32).at[:M].set(
        jnp.transpose(weights_real.astype(jnp.float32), (2, 0, 1)))
    wi = jnp.zeros((Mp, Cin, Cout), jnp.float32).at[:M].set(
        jnp.transpose(weights_imag.astype(jnp.float32), (2, 0, 1)))

    x2d = x.reshape(B * Cin, N)
    Bt = _pick_batch_tile(B, Cin, Cout, N, N_pad, Mp)
    grid = (B // Bt,)

    kernel = functools.partial(_spectral_conv1d_kernel,
                               bt=Bt, cin=Cin, cout=Cout, mp=Mp)

    # TODO(synk): optionally cast x / bases to bfloat16 (keeping f32 accumulation)
    # for ~2x MXU throughput on v6e/v7x; kept f32 here to preserve tolerances.
    out2d = pl.pallas_call(
        kernel,
        out_shape=jax.ShapeDtypeStruct((B * Cout, N_pad), x.dtype),
        grid=grid,
        in_specs=[
            pl.BlockSpec((Bt * Cin, N), lambda b: (b, 0)),         # x, Bt batches / step
            pl.BlockSpec((2 * Mp, N), lambda b: (0, 0)),           # fused forward basis
            pl.BlockSpec((2 * Mp, N_pad), lambda b: (0, 0)),       # fused inverse basis
            pl.BlockSpec((Mp, Cin, Cout), lambda b: (0, 0, 0)),    # weights (real)
            pl.BlockSpec((Mp, Cin, Cout), lambda b: (0, 0, 0)),    # weights (imag)
        ],
        out_specs=pl.BlockSpec((Bt * Cout, N_pad), lambda b: (b, 0)),
        compiler_params=pltpu.CompilerParams(
            dimension_semantics=("parallel",),
            vmem_limit_bytes=48 << 20),    # above default scoped limits, < v7x physical
    )(x2d, fwd, inv, wr, wi)

    return out2d.reshape(B, Cout, N_pad)[:, :, :N]


def spectral_conv1d_reference(x, weights_real, weights_imag, modes1):
    """Pure-JAX reference matching the PyTorch forward exactly."""
    B, Cin, N = x.shape
    Cout = weights_real.shape[1]
    w = weights_real.astype(jnp.complex64) + 1j * weights_imag.astype(jnp.complex64)
    x_ft = jnp.fft.rfft(x, axis=-1)
    out_ft = jnp.zeros((B, Cout, N // 2 + 1), dtype=jnp.complex64)
    prod = jnp.einsum('bix,iox->box', x_ft[:, :, :modes1], w)
    out_ft = out_ft.at[:, :, :modes1].set(prod)
    return jnp.fft.irfft(out_ft, n=N, axis=-1)


if __name__ == "__main__":
    # Small shapes consistent with the module: in_channels=4, out_channels=4,
    # spatial N=16 (rfft length 9), modes1=5, batch=2.
    B, Cin, Cout, N, modes1 = 2, 4, 4, 16, 5

    key = jax.random.PRNGKey(0)
    kx, kwr, kwi = jax.random.split(key, 3)

    x = jax.random.normal(kx, (B, Cin, N), dtype=jnp.float32)

    # Deterministic parameter init mirroring:
    #   scale * torch.rand(in_channels, out_channels, modes1, dtype=cfloat)
    scale = 1.0 / (Cin * Cout)
    weights_real = scale * jax.random.uniform(kwr, (Cin, Cout, modes1), dtype=jnp.float32)
    weights_imag = scale * jax.random.uniform(kwi, (Cin, Cout, modes1), dtype=jnp.float32)

    out = jax.block_until_ready(spectral_conv1d(x, weights_real, weights_imag))
    ref = jax.block_until_ready(
        spectral_conv1d_reference(x, weights_real, weights_imag, modes1))

    np.testing.assert_allclose(np.asarray(out), np.asarray(ref), rtol=1e-4, atol=3e-5)
    print("KERNEL_OK")
</pallas_src>

<mosaic_0001>
module attributes {stable_mosaic.version = 11 : i64} {
  func.func @_spectral_conv1d_kernel(%arg0: i32, %arg1: memref<8x16xf32, #tpu.memory_space<vmem>>, %arg2: memref<16x16xf32, #tpu.memory_space<vmem>>, %arg3: memref<16x128xf32, #tpu.memory_space<vmem>>, %arg4: memref<8x4x4xf32, #tpu.memory_space<vmem>>, %arg5: memref<8x4x4xf32, #tpu.memory_space<vmem>>, %arg6: memref<8x128xf32, #tpu.memory_space<vmem>>) attributes {dimension_semantics = [#tpu.dimension_semantics<parallel>], iteration_bounds = array<i64: 1>, scalar_prefetch = 0 : i64, scratch_operands = 0 : i64, tpu.core_type = #tpu.core_type<tc>, window_params = [{transform_indices = @transform_0, window_bounds = array<i64: 8, 16>}, {pipeline_mode = #tpu.pipeline_mode<synchronous>, transform_indices = @transform_1, window_bounds = array<i64: 16, 16>}, {pipeline_mode = #tpu.pipeline_mode<synchronous>, transform_indices = @transform_2, window_bounds = array<i64: 16, 128>}, {pipeline_mode = #tpu.pipeline_mode<synchronous>, transform_indices = @transform_3, window_bounds = array<i64: 8, 4, 4>}, {pipeline_mode = #tpu.pipeline_mode<synchronous>, transform_indices = @transform_4, window_bounds = array<i64: 8, 4, 4>}, {transform_indices = @transform_5, window_bounds = array<i64: 8, 128>}]} {
    %c0 = arith.constant 0 : index
    %c0_0 = arith.constant 0 : index
    %0 = vector.load %arg2[%c0, %c0_0] : memref<16x16xf32, #tpu.memory_space<vmem>>, vector<16x16xf32>
    %c0_1 = arith.constant 0 : index
    %c0_2 = arith.constant 0 : index
    %1 = vector.load %arg1[%c0_1, %c0_2] : memref<8x16xf32, #tpu.memory_space<vmem>>, vector<8x16xf32>
    %cst = arith.constant dense<0.000000e+00> : vector<16x8xf32>
    %2 = tpu.matmul %0, %1, %cst {dimension_numbers = #tpu.dot_dimension_numbers<[1], [1], [0], [0], [0, 0, 1, 0], [], []>} : vector<16x16xf32>, vector<8x16xf32>, vector<16x8xf32> -> vector<16x8xf32>
    %3 = vector.shape_cast %2 : vector<16x8xf32> to vector<16x2x4xf32>
    %4 = vector.extract_strided_slice %3 {offsets = [0, 0, 0], sizes = [8, 2, 4], strides = [1, 1, 1]} : vector<16x2x4xf32> to vector<8x2x4xf32>
    %5 = vector.extract_strided_slice %3 {offsets = [8, 0, 0], sizes = [8, 2, 4], strides = [1, 1, 1]} : vector<16x2x4xf32> to vector<8x2x4xf32>
    %c0_3 = arith.constant 0 : index
    %c0_4 = arith.constant 0 : index
    %c0_5 = arith.constant 0 : index
    %6 = vector.load %arg4[%c0_3, %c0_4, %c0_5] : memref<8x4x4xf32, #tpu.memory_space<vmem>>, vector<8x4x4xf32>
    %c0_6 = arith.constant 0 : index
    %c0_7 = arith.constant 0 : index
    %c0_8 = arith.constant 0 : index
    %7 = vector.load %arg5[%c0_6, %c0_7, %c0_8] : memref<8x4x4xf32, #tpu.memory_space<vmem>>, vector<8x4x4xf32>
    %cst_9 = arith.constant dense<0.000000e+00> : vector<8x2x4xf32>
    %8 = tpu.matmul %4, %6, %cst_9 {dimension_numbers = #tpu.dot_dimension_numbers<[2], [1], [1], [2], [0, 0, 0, 1, 1, 2], [0], [0]>} : vector<8x2x4xf32>, vector<8x4x4xf32>, vector<8x2x4xf32> -> vector<8x2x4xf32>
    %cst_10 = arith.constant dense<0.000000e+00> : vector<8x2x4xf32>
    %9 = tpu.matmul %5, %7, %cst_10 {dimension_numbers = #tpu.dot_dimension_numbers<[2], [1], [1], [2], [0, 0, 0, 1, 1, 2], [0], [0]>} : vector<8x2x4xf32>, vector<8x4x4xf32>, vector<8x2x4xf32> -> vector<8x2x4xf32>
    %10 = arith.subf %8, %9 : vector<8x2x4xf32>
    %cst_11 = arith.constant dense<0.000000e+00> : vector<8x2x4xf32>
    %11 = tpu.matmul %4, %7, %cst_11 {dimension_numbers = #tpu.dot_dimension_numbers<[2], [1], [1], [2], [0, 0, 0, 1, 1, 2], [0], [0]>} : vector<8x2x4xf32>, vector<8x4x4xf32>, vector<8x2x4xf32> -> vector<8x2x4xf32>
    %cst_12 = arith.constant dense<0.000000e+00> : vector<8x2x4xf32>
    %12 = tpu.matmul %5, %6, %cst_12 {dimension_numbers = #tpu.dot_dimension_numbers<[2], [1], [1], [2], [0, 0, 0, 1, 1, 2], [0], [0]>} : vector<8x2x4xf32>, vector<8x4x4xf32>, vector<8x2x4xf32> -> vector<8x2x4xf32>
    %13 = arith.addf %11, %12 : vector<8x2x4xf32>
    %14 = tpu.concatenate %10, %13 in 0 : vector<8x2x4xf32>, vector<8x2x4xf32> -> vector<16x2x4xf32>
    %15 = vector.shape_cast %14 : vector<16x2x4xf32> to vector<16x8xf32>
    %c0_13 = arith.constant 0 : index
    %c0_14 = arith.constant 0 : index
    %16 = vector.load %arg3[%c0_13, %c0_14] : memref<16x128xf32, #tpu.memory_space<vmem>>, vector<16x128xf32>
    %cst_15 = arith.constant dense<0.000000e+00> : vector<8x128xf32>
    %17 = tpu.matmul %15, %16, %cst_15 {dimension_numbers = #tpu.dot_dimension_numbers<[0], [0], [1], [1], [0, 1, 1, 1], [], []>} : vector<16x8xf32>, vector<16x128xf32>, vector<8x128xf32> -> vector<8x128xf32>
    %c0_16 = arith.constant 0 : index
    %c0_17 = arith.constant 0 : index
    %18 = vector.load %arg6[%c0_16, %c0_17] : memref<8x128xf32, #tpu.memory_space<vmem>>, vector<8x128xf32>
    tpu.vector_store %arg6[%c0_16, %c0_17], %17 {strides = array<i32>} : memref<8x128xf32, #tpu.memory_space<vmem>>, vector<8x128xf32>,
    return
  }
  func.func @transform_0(%arg0: i32) -> (i32, i32) {
    %c0_i32 = arith.constant 0 : i32
    %c0_i32_0 = arith.constant 0 : i32
    return %arg0, %c0_i32 : i32, i32
  }
  func.func @transform_1(%arg0: i32) -> (i32, i32) {
    %c0_i32 = arith.constant 0 : i32
    %c0_i32_0 = arith.constant 0 : i32
    %c0_i32_1 = arith.constant 0 : i32
    return %c0_i32, %c0_i32_0 : i32, i32
  }
  func.func @transform_2(%arg0: i32) -> (i32, i32) {
    %c0_i32 = arith.constant 0 : i32
    %c0_i32_0 = arith.constant 0 : i32
    %c0_i32_1 = arith.constant 0 : i32
    return %c0_i32, %c0_i32_0 : i32, i32
  }
  func.func @transform_3(%arg0: i32) -> (i32, i32, i32) {
    %c0_i32 = arith.constant 0 : i32
    %c0_i32_0 = arith.constant 0 : i32
    %c0_i32_1 = arith.constant 0 : i32
    %c0_i32_2 = arith.constant 0 : i32
    return %c0_i32, %c0_i32_0, %c0_i32_1 : i32, i32, i32
  }
  func.func @transform_4(%arg0: i32) -> (i32, i32, i32) {
    %c0_i32 = arith.constant 0 : i32
    %c0_i32_0 = arith.constant 0 : i32
    %c0_i32_1 = arith.constant 0 : i32
    %c0_i32_2 = arith.constant 0 : i32
    return %c0_i32, %c0_i32_0, %c0_i32_1 : i32, i32, i32
  }
  func.func @transform_5(%arg0: i32) -> (i32, i32) {
    %c0_i32 = arith.constant 0 : i32
    %c0_i32_0 = arith.constant 0 : i32
    return %arg0, %c0_i32 : i32, i32
  }
}

</mosaic_0001>

<bundles_post_ra>
// kernel: tpu_custom_call.1
= control target key start
LH: loop header
LB: loop body
LE: loop exit
PB: predicated region body
PF: predicated region fallthrough
CT: control target
= control target key end

     0   :  { %vm24_vm0 = vcmask 130048   ;;  %s3602_s0 = inlined_call_operand.vmem [shape: f32[8,16], index: 0, kind: input, shape index: {}]   ;;  %s3603_s1 = inlined_call_operand.vmem [shape: f32[16,16], index: 1, kind: input, shape index: {}]   ;;  %s3604_s2 = inlined_call_operand.vmem [shape: f32[16,128], index: 2, kind: input, shape index: {}]   ;;  %s3605_s3 = inlined_call_operand.vmem [shape: f32[8,4,4], index: 3, kind: input, shape index: {}]   ;;  %s3606_s4 = inlined_call_operand.vmem [shape: f32[8,4,4], index: 4, kind: input, shape index: {}]   ;;  %s3607_s5 = inlined_call_operand.hbm [shape: f32[8,128], index: 5, kind: output, shape index: {}]  }
   0x1   :  { %v23_v0 = vld [vmem:[%s3602_s0] sm:$0xff] }
   0x2   :  { %v21_v1 = vld [vmem:[%s3603_s1] sm:$0xff]  ;;  %2981 = vmatprep.subr.msk.mxu0 %vm24_vm0, %v23_v0 }
   0x3   :  { %2983 = vmatprep.mubr.msk.f32.mxu0 %vm24_vm0, %v21_v1 }
   0x4   :  { %10 = vsyncpa [#allocation3], 0  ;;  %2982 = vmatpush3.xpose.msk.msra.mxu0 %vm24_vm0, %v23_v0  ;;  %v22_v2 = vld [vmem:[%s3603_s1 + $0x8] sm:$0xff]  ;;  %v3182_v3 = vmov 0.0   ;;  %v3237_v4 = vld [vmem:[%s3605_s3] sm:$0xf]  ;;  %v121_v10 = vlaneseq }
   0x5   :  { %2986 = vmatprep.subr.mxu1 %v3182_v3  ;;  %2996 = vmatprep.subr.mxu0 %v3182_v3  ;;  %vm269_vm1 = vcmask 1043456   ;;  %v3242_v5 = vld [vmem:[%s3605_s3 + $0x8] sm:$0xf]  ;;  %vm3183_vm2 = vmmov 0   ;;  %s3184_s1 = smov 124   ;;  %vm265_vm3 = vcmask 31744  }
   0x6   :  { %2987 = vmatpush3.msk.msra.mxu1 %vm269_vm1, %v3237_v4  ;;  %2988 = vmatprep.mubr.msk.f32.mxu1 %vm3183_vm2, %v3182_v3  ;;  %v3185_v8 = vmov 1983009808   ;;  %v3186_v11 = vmov 1934713408   ;;  %v122_v14 = vshrl.u32 %v121_v10, 7 }
   0x7   :  { %2984 = vmatmul.mubr.msk.f32.vlgmr.msra.gmra.mxu0 %vm24_vm0, %v22_v2  ;;  %2991 = vmatprep.subr.mxu1 %v3182_v3  ;;  %v119_v9 = vunpack.c.l.s4 %v3185_v8  ;;  %v150_v12 = vunpack.c.l.s4 %v3186_v11  ;;  %v3273_v29 = vld [vmem:[%s3605_s3 + $0x4] sm:$0xf]  ;;  %v3280_v31 = vld [vmem:[%s3605_s3 + $0x10] sm:$0xf]  ;;  %v3296_v34 = vld [vmem:[%s3605_s3 + $0xc] sm:$0xf] }
   0x8   :  { %2997 = vmatpush3.msk.msra.mxu0 %vm269_vm1, %v3242_v5  ;;  %2998 = vmatprep.mubr.msk.f32.mxu0 %vm3183_vm2, %v3182_v3  ;;  %v3313_v38 = vld [vmem:[%s3605_s3 + $0x18] sm:$0xf]  ;;  %v3329_v41 = vld [vmem:[%s3605_s3 + $0x14] sm:$0xf]  ;;  %v3345_v45 = vld [vmem:[%s3606_s4] sm:$0xf] }
   0x9   :  { %3006 = vmatprep.subr.mxu0 %v3182_v3  ;;  %v120_v13 = vunpack.c.0.s8 %v119_v9  ;;  %v151_v15 = vunpack.c.0.s8 %v150_v12  ;;  %v3362_v48 = vld [vmem:[%s3605_s3 + $0x1c] sm:$0xf]  ;;  %v3376_v52 = vld [vmem:[%s3606_s4 + $0x8] sm:$0xf]  ;;  %v3392_v55 = vld [vmem:[%s3606_s4 + $0x4] sm:$0xf] }
   0xa   :  { %v3405_v58 = vld [vmem:[%s3606_s4 + $0x10] sm:$0xf]  ;;  %v3417_v60 = vld [vmem:[%s3606_s4 + $0xc] sm:$0xf]  ;;  %v3429_v63 = vld [vmem:[%s3606_s4 + $0x18] sm:$0xf] }
   0xb   :  { %v3254_v16 = vsub.s32 %v120_v13, %v122_v14  ;;  %v3256_v17 = vsub.s32 %v151_v15, %v122_v14  ;;  %v3441_v1 = vld [vmem:[%s3606_s4 + $0x14] sm:$0xf] }
  0xc7   :  { %v2985_v6 = vpop.f32.mrf.mxu0 }
  0xc8   :  { %v190_v39 = vrot.slane %v2985_v6, %v3254_v16  ;;  %v183_v46 = vcombine.high %v2985_v6, %v3182_v3 }
  0xc9   :  { %v100_v7 = vpop.f32.mrf.mxu0 }
  0xca   :  { %111 = vrot.lane.b32.xlu0 %v100_v7, %s3184_s1  ;;  %v117_v19 = vcombine.high %v100_v7, %v3182_v3  ;;  %v124_v20 = vrot.slane %v100_v7, %v3254_v16  ;;  %v197_v53 = vrot.slane %v183_v46, %v3254_v16  ;;  %v3460_v7 = vld [vmem:[%s3606_s4 + $0x1c] sm:$0xf]  ;;  %s3187_s4 = smov 4  }
  0xcc   :  { %v131_v26 = vrot.slane %v117_v19, %v3254_v16 }
  0xce   :  { %113 = vrot.lane.b32.xlu0 %v2985_v6, %s3184_s1 }
 0x13c   :  { %v112_v18 = vpop.permute.xlu0 %111 }
 0x13d   :  { %v132_v21 = vcombine.high %v112_v18, %v3182_v3  ;;  %v139_v22 = vrot.slane %v112_v18, %v3254_v16 }
 0x13f   :  { %v146_v23 = vrot.slane %v132_v21, %v3254_v16  ;;  %v147_v24 = vcombine.low %v124_v20, %v139_v22  ;;  %v148_v25 = vcombine.high %v124_v20, %v139_v22 }
 0x140   :  { %v114_v32 = vpop.permute.xlu0 %113 }
 0x141   :  { %v3265_v27 = vrot.slane %v147_v24, %v3256_v17  ;;  %v3268_v28 = vrot.slane %v148_v25, %v3256_v17  ;;  %v163_v30 = vcombine.low %v131_v26, %v146_v23  ;;  %v164_v35 = vcombine.high %v131_v26, %v146_v23 }
 0x142   :  { %v205_v37 = vrot.slane %v114_v32, %v3254_v16  ;;  %v198_v43 = vcombine.high %v114_v32, %v3182_v3 }
 0x143   :  { %2989 = vmatmul.mubr.msk.f32.vlgmr.msra.gmra.mxu1 %vm265_vm3, %v3265_v27  ;;  %2999 = vmatmul.mubr.msk.f32.vlgmr.msra.gmra.mxu0 %vm265_vm3, %v3268_v28  ;;  %v3288_v33 = vcombine.high %v3265_v27, %v3182_v3  ;;  %v3301_v36 = vrot.slane %v163_v30, %v3256_v17  ;;  %v3321_v40 = vcombine.high %v3268_v28, %v3182_v3 }
 0x144   :  { %2992 = vmatpush3.msk.msra.mxu1 %vm269_vm1, %v3273_v29  ;;  %2993 = vmatprep.mubr.msk.f32.mxu1 %vm3183_vm2, %v3182_v3  ;;  %v3332_v42 = vrot.slane %v164_v35, %v3256_v17  ;;  %v213_v44 = vcombine.low %v190_v39, %v205_v37  ;;  %v212_v49 = vrot.slane %v198_v43, %v3254_v16 }
 0x145   :  { %3001 = vmatprep.subr.mxu1 %v3182_v3  ;;  %3007 = vmatpush3.msk.msra.mxu0 %vm269_vm1, %v3280_v31  ;;  %v3357_v47 = vcombine.high %v3301_v36, %v3182_v3  ;;  %v214_v50 = vcombine.high %v190_v39, %v205_v37 }
 0x146   :  { %3008 = vmatprep.mubr.msk.f32.mxu0 %vm3183_vm2, %v3182_v3  ;;  %3016 = vmatprep.subr.mxu0 %v3182_v3  ;;  %v221_v51 = vrot.slane %v213_v44, %v3256_v17  ;;  %v3387_v54 = vcombine.high %v3332_v42, %v3182_v3  ;;  %v229_v57 = vcombine.low %v197_v53, %v212_v49 }
 0x147   :  { %2994 = vmatmul.mubr.msk.f32.vlgmr.msra.gmra.mxu1 %vm265_vm3, %v3288_v33  ;;  %3009 = vmatmul.mubr.msk.f32.vlgmr.msra.gmra.mxu0 %vm265_vm3, %v3301_v36  ;;  %v228_v56 = vrot.slane %v214_v50, %v3256_v17  ;;  %v230_v61 = vcombine.high %v197_v53, %v212_v49 }
 0x148   :  { %3002 = vmatpush3.msk.msra.mxu1 %vm269_vm1, %v3296_v34  ;;  %3003 = vmatprep.mubr.msk.f32.mxu1 %vm3183_vm2, %v3182_v3  ;;  %v245_v59 = vcombine.high %v221_v51, %v3182_v3  ;;  %v237_v62 = vrot.slane %v229_v57, %v3256_v17 }
 0x149   :  { %3011 = vmatprep.subr.mxu1 %v3182_v3  ;;  %3017 = vmatpush3.msk.msra.mxu0 %vm269_vm1, %v3313_v38  ;;  %v246_v0 = vcombine.high %v228_v56, %v3182_v3  ;;  %v244_v2 = vrot.slane %v230_v61, %v3256_v17 }
 0x14a   :  { %3018 = vmatprep.mubr.msk.f32.mxu0 %vm3183_vm2, %v3182_v3  ;;  %3026 = vmatprep.subr.mxu0 %v3182_v3  ;;  %v247_v6 = vcombine.high %v237_v62, %v3182_v3 }
 0x14b   :  { %3004 = vmatmul.mubr.msk.f32.vlgmr.msra.gmra.mxu1 %vm265_vm3, %v3321_v40  ;;  %3019 = vmatmul.mubr.msk.f32.vlgmr.msra.gmra.mxu0 %vm265_vm3, %v3332_v42  ;;  %v248_v8 = vcombine.high %v244_v2, %v3182_v3 }
 0x14c   :  { %3012 = vmatpush3.msk.msra.mxu1 %vm269_vm1, %v3329_v41  ;;  %3013 = vmatprep.mubr.msk.f32.mxu1 %vm3183_vm2, %v3182_v3 }
 0x14d   :  { %3021 = vmatprep.subr.mxu1 %v3182_v3  ;;  %3027 = vmatpush3.msk.msra.mxu0 %vm269_vm1, %v3345_v45 }
 0x14e   :  { %3028 = vmatprep.mubr.msk.f32.mxu0 %vm3183_vm2, %v3182_v3  ;;  %3036 = vmatprep.subr.mxu0 %v3182_v3 }
 0x14f   :  { %3014 = vmatmul.mubr.msk.f32.vlgmr.msra.gmra.mxu1 %vm265_vm3, %v3357_v47  ;;  %3029 = vmatmul.mubr.msk.f32.vlgmr.msra.gmra.mxu0 %vm265_vm3, %v221_v51 }
 0x150   :  { %3022 = vmatpush3.msk.msra.mxu1 %vm269_vm1, %v3362_v48  ;;  %3023 = vmatprep.mubr.msk.f32.mxu1 %vm3183_vm2, %v3182_v3 }
 0x151   :  { %3031 = vmatprep.subr.mxu1 %v3182_v3  ;;  %3037 = vmatpush3.msk.msra.mxu0 %vm269_vm1, %v3376_v52 }
 0x152   :  { %3038 = vmatprep.mubr.msk.f32.mxu0 %vm3183_vm2, %v3182_v3  ;;  %3046 = vmatprep.subr.mxu0 %v3182_v3 }
 0x153   :  { %3024 = vmatmul.mubr.msk.f32.vlgmr.msra.gmra.mxu1 %vm265_vm3, %v3387_v54  ;;  %3039 = vmatmul.mubr.msk.f32.vlgmr.msra.gmra.mxu0 %vm265_vm3, %v228_v56 }
 0x154   :  { %3032 = vmatpush3.msk.msra.mxu1 %vm269_vm1, %v3392_v55  ;;  %3033 = vmatprep.mubr.msk.f32.mxu1 %vm3183_vm2, %v3182_v3 }
 0x155   :  { %3041 = vmatprep.subr.mxu1 %v3182_v3  ;;  %3047 = vmatpush3.msk.msra.mxu0 %vm269_vm1, %v3405_v58 }
 0x156   :  { %3048 = vmatprep.mubr.msk.f32.mxu0 %vm3183_vm2, %v3182_v3  ;;  %3056 = vmatprep.subr.mxu0 %v3182_v3 }
 0x157   :  { %3034 = vmatmul.mubr.msk.f32.vlgmr.msra.gmra.mxu1 %vm265_vm3, %v245_v59  ;;  %3049 = vmatmul.mubr.msk.f32.vlgmr.msra.gmra.mxu0 %vm265_vm3, %v237_v62 }
 0x158   :  { %3042 = vmatpush3.msk.msra.mxu1 %vm269_vm1, %v3417_v60  ;;  %3043 = vmatprep.mubr.msk.f32.mxu1 %vm3183_vm2, %v3182_v3 }
 0x159   :  { %3051 = vmatprep.subr.mxu1 %v3182_v3  ;;  %3057 = vmatpush3.msk.msra.mxu0 %vm269_vm1, %v3429_v63 }
 0x15a   :  { %3058 = vmatprep.mubr.msk.f32.mxu0 %vm3183_vm2, %v3182_v3  ;;  %3066 = vmatprep.subr.mxu0 %v3182_v3 }
 0x15b   :  { %3044 = vmatmul.mubr.msk.f32.vlgmr.msra.gmra.mxu1 %vm265_vm3, %v246_v0  ;;  %3059 = vmatmul.mubr.msk.f32.vlgmr.msra.gmra.mxu0 %vm265_vm3, %v244_v2 }
 0x15c   :  { %3052 = vmatpush3.msk.msra.mxu1 %vm269_vm1, %v3441_v1  ;;  %3053 = vmatprep.mubr.msk.f32.mxu1 %vm3183_vm2, %v3182_v3 }
 0x15d   :  { %3061 = vmatprep.subr.mxu1 %v3182_v3  ;;  %3067 = vmatpush3.msk.msra.mxu0 %vm269_vm1, %v3237_v4 }
 0x15e   :  { %3068 = vmatprep.mubr.msk.f32.mxu0 %vm3183_vm2, %v3182_v3  ;;  %3076 = vmatprep.subr.mxu0 %v3182_v3 }
 0x15f   :  { %3054 = vmatmul.mubr.msk.f32.vlgmr.msra.gmra.mxu1 %vm265_vm3, %v247_v6  ;;  %3069 = vmatmul.mubr.msk.f32.vlgmr.msra.gmra.mxu0 %vm265_vm3, %v221_v51 }
 0x160   :  { %3062 = vmatpush3.msk.msra.mxu1 %vm269_vm1, %v3460_v7  ;;  %3063 = vmatprep.mubr.msk.f32.mxu1 %vm3183_vm2, %v3182_v3 }
 0x161   :  { %3071 = vmatprep.subr.mxu1 %v3182_v3  ;;  %3077 = vmatpush3.msk.msra.mxu0 %vm269_vm1, %v3242_v5 }
 0x162   :  { %3078 = vmatprep.mubr.msk.f32.mxu0 %vm3183_vm2, %v3182_v3  ;;  %3086 = vmatprep.subr.mxu0 %v3182_v3 }
 0x163   :  { %3064 = vmatmul.mubr.msk.f32.vlgmr.msra.gmra.mxu1 %vm265_vm3, %v248_v8  ;;  %3079 = vmatmul.mubr.msk.f32.vlgmr.msra.gmra.mxu0 %vm265_vm3, %v228_v56 }
 0x164   :  { %3072 = vmatpush3.msk.msra.mxu1 %vm269_vm1, %v3273_v29  ;;  %3073 = vmatprep.mubr.msk.f32.mxu1 %vm3183_vm2, %v3182_v3 }
 0x165   :  { %3081 = vmatprep.subr.mxu1 %v3182_v3  ;;  %3087 = vmatpush3.msk.msra.mxu0 %vm269_vm1, %v3280_v31 }
 0x166   :  { %3088 = vmatprep.mubr.msk.f32.mxu0 %vm3183_vm2, %v3182_v3  ;;  %3096 = vmatprep.subr.mxu0 %v3182_v3 }
 0x167   :  { %3074 = vmatmul.mubr.msk.f32.vlgmr.msra.gmra.mxu1 %vm265_vm3, %v245_v59  ;;  %3089 = vmatmul.mubr.msk.f32.vlgmr.msra.gmra.mxu0 %vm265_vm3, %v237_v62 }
 0x168   :  { %3082 = vmatpush3.msk.msra.mxu1 %vm269_vm1, %v3296_v34  ;;  %3083 = vmatprep.mubr.msk.f32.mxu1 %vm3183_vm2, %v3182_v3 }
 0x169   :  { %3091 = vmatprep.subr.mxu1 %v3182_v3  ;;  %3097 = vmatpush3.msk.msra.mxu0 %vm269_vm1, %v3313_v38 }
 0x16a   :  { %3098 = vmatprep.mubr.msk.f32.mxu0 %vm3183_vm2, %v3182_v3  ;;  %3106 = vmatprep.subr.mxu0 %v3182_v3 }
 0x16b   :  { %3084 = vmatmul.mubr.msk.f32.vlgmr.msra.gmra.mxu1 %vm265_vm3, %v246_v0  ;;  %3099 = vmatmul.mubr.msk.f32.vlgmr.msra.gmra.mxu0 %vm265_vm3, %v244_v2 }
 0x16c   :  { %3092 = vmatpush3.msk.msra.mxu1 %vm269_vm1, %v3329_v41  ;;  %3093 = vmatprep.mubr.msk.f32.mxu1 %vm3183_vm2, %v3182_v3 }
 0x16d   :  { %3101 = vmatprep.subr.mxu1 %v3182_v3  ;;  %3107 = vmatpush3.msk.msra.mxu0 %vm269_vm1, %v3345_v45 }
 0x16e   :  { %3108 = vmatprep.mubr.msk.f32.mxu0 %vm3183_vm2, %v3182_v3  ;;  %3116 = vmatprep.subr.mxu0 %v3182_v3 }
 0x16f   :  { %3094 = vmatmul.mubr.msk.f32.vlgmr.msra.gmra.mxu1 %vm265_vm3, %v247_v6  ;;  %3109 = vmatmul.mubr.msk.f32.vlgmr.msra.gmra.mxu0 %vm265_vm3, %v3265_v27 }
 0x170   :  { %3102 = vmatpush3.msk.msra.mxu1 %vm269_vm1, %v3362_v48  ;;  %3103 = vmatprep.mubr.msk.f32.mxu1 %vm3183_vm2, %v3182_v3 }
 0x171   :  { %3111 = vmatprep.subr.mxu1 %v3182_v3  ;;  %3117 = vmatpush3.msk.msra.mxu0 %vm269_vm1, %v3376_v52 }
 0x172   :  { %3118 = vmatprep.mubr.msk.f32.mxu0 %vm3183_vm2, %v3182_v3  ;;  %3126 = vmatprep.subr.mxu0 %v3182_v3 }
 0x173   :  { %3104 = vmatmul.mubr.msk.f32.vlgmr.msra.gmra.mxu1 %vm265_vm3, %v248_v8  ;;  %3119 = vmatmul.mubr.msk.f32.vlgmr.msra.gmra.mxu0 %vm265_vm3, %v3268_v28 }
 0x174   :  { %3112 = vmatpush3.msk.msra.mxu1 %vm269_vm1, %v3392_v55  ;;  %3113 = vmatprep.mubr.msk.f32.mxu1 %vm3183_vm2, %v3182_v3 }
 0x175   :  { %3121 = vmatprep.subr.mxu1 %v3182_v3  ;;  %3127 = vmatpush3.msk.msra.mxu0 %vm269_vm1, %v3405_v58 }
 0x176   :  { %3128 = vmatprep.mubr.msk.f32.mxu0 %vm3183_vm2, %v3182_v3  ;;  %3136 = vmatprep.subr.mxu0 %v3182_v3 }
 0x177   :  { %3114 = vmatmul.mubr.msk.f32.vlgmr.msra.gmra.mxu1 %vm265_vm3, %v3288_v33  ;;  %3129 = vmatmul.mubr.msk.f32.vlgmr.msra.gmra.mxu0 %vm265_vm3, %v3301_v36 }
 0x178   :  { %3122 = vmatpush3.msk.msra.mxu1 %vm269_vm1, %v3417_v60  ;;  %3123 = vmatprep.mubr.msk.f32.mxu1 %vm3183_vm2, %v3182_v3 }
 0x179   :  { %3131 = vmatprep.subr.mxu1 %v3182_v3  ;;  %3137 = vmatpush3.msk.msra.mxu0 %vm269_vm1, %v3429_v63 }
 0x17a   :  { %3138 = vmatprep.mubr.msk.f32.mxu0 %vm3183_vm2, %v3182_v3  ;;  %3146 = vmatprep.subr.mxu0 %v3182_v3 }
 0x17b   :  { %3124 = vmatmul.mubr.msk.f32.vlgmr.msra.gmra.mxu1 %vm265_vm3, %v3321_v40  ;;  %3139 = vmatmul.mubr.msk.f32.vlgmr.msra.gmra.mxu0 %vm265_vm3, %v3332_v42 }
 0x17c   :  { %3132 = vmatpush3.msk.msra.mxu1 %vm269_vm1, %v3441_v1  ;;  %3133 = vmatprep.mubr.msk.f32.mxu1 %vm3183_vm2, %v3182_v3 }
 0x17d   :  { %3141 = vmatprep.subr.mxu1 %v3182_v3  ;;  %3150 = vmatprep.mubr.msk.f32.mxu0 %vm3183_vm2, %v3182_v3 }
 0x17f   :  { %3134 = vmatmul.mubr.msk.f32.vlgmr.msra.gmra.mxu1 %vm265_vm3, %v3357_v47 }
 0x180   :  { %3142 = vmatpush3.msk.msra.mxu1 %vm269_vm1, %v3460_v7  ;;  %3143 = vmatprep.mubr.msk.f32.mxu1 %vm3183_vm2, %v3182_v3 }
 0x183   :  { %3144 = vmatmul.mubr.msk.f32.vlgmr.msra.gmra.mxu1 %vm265_vm3, %v3387_v54 }
 0x203   :  { %v339_v4 = vpop.f32.mrf.mxu1  ;;  %v491_v5 = vpop.f32.mrf.mxu0 }
 0x205   :  { %v2990_v9 = vpop.f32.mrf.mxu1  ;;  %v3000_v10 = vpop.f32.mrf.mxu0 }
 0x207   :  { %v415_v11 = vpop.f32.mrf.mxu1  ;;  %v643_v12 = vpop.f32.mrf.mxu0 }
 0x209   :  { %v2995_v13 = vpop.f32.mrf.mxu1  ;;  %v3010_v14 = vpop.f32.mrf.mxu0 }
 0x20b   :  { %v567_v15 = vpop.f32.mrf.mxu1  ;;  %v795_v18 = vpop.f32.mrf.mxu0 }
 0x20d   :  { %v3005_v19 = vpop.f32.mrf.mxu1  ;;  %v3020_v20 = vpop.f32.mrf.mxu0 }
 0x20f   :  { %v719_v21 = vpop.f32.mrf.mxu1  ;;  %v947_v22 = vpop.f32.mrf.mxu0 }
 0x210   :  { %v1483_v41 = vsub.f32 %v339_v4, %v947_v22 }
 0x211   :  { %v3015_v23 = vpop.f32.mrf.mxu1  ;;  %v3030_v24 = vpop.f32.mrf.mxu0 }
 0x213   :  { %v871_v25 = vpop.f32.mrf.mxu1  ;;  %v1099_v26 = vpop.f32.mrf.mxu0 }
 0x214   :  { %v1485_v37 = vsub.f32 %v491_v5, %v1099_v26 }
 0x215   :  { %v3025_v27 = vpop.f32.mrf.mxu1  ;;  %v3040_v28 = vpop.f32.mrf.mxu0 }
 0x216   :  { %v2611_v46 = vcombine.low %v1483_v41, %v1485_v37 }
 0x217   :  { %v1023_v29 = vpop.f32.mrf.mxu1  ;;  %v1251_v30 = vpop.f32.mrf.mxu0 }
 0x218   :  { %v1484_v38 = vsub.f32 %v415_v11, %v1023_v29  ;;  %v1487_v47 = vsub.f32 %v643_v12, %v1251_v30  ;;  %v2618_v56 = vrot.slane %v2611_v46, %v3254_v16  ;;  %v2722_v46 = vld [vmem:[%s3604_s2 + $0x8] sm:$0xff] }
 0x219   :  { %v3035_v31 = vpop.f32.mrf.mxu1  ;;  %v3050_v32 = vpop.f32.mrf.mxu0  ;;  %3147 = vmatpush3.msra.mxu0 %v2722_v46 }
 0x21a   :  { %3148 = vmatprep.subr.mxu0 %v3182_v3 }
 0x21b   :  { %v1175_v33 = vpop.f32.mrf.mxu1  ;;  %v1403_v35 = vpop.f32.mrf.mxu0 }
 0x21c   :  { %v1486_v34 = vsub.f32 %v567_v15, %v1175_v33  ;;  %v1489_v43 = vsub.f32 %v795_v18, %v1403_v35 }
 0x21d   :  { %v3045_v36 = vpop.f32.mrf.mxu1  ;;  %v3060_v39 = vpop.f32.mrf.mxu0 }
 0x21e   :  { %v2619_v42 = vcombine.low %v1484_v38, %v1486_v34  ;;  %v2627_v51 = vcombine.low %v1487_v47, %v1489_v43  ;;  %v2721_v47 = vld [vmem:[%s3604_s2] sm:$0xff]  ;;  %s3188_s2 = smov [#allocation2]  }
 0x21f   :  { %v1327_v40 = vpop.f32.mrf.mxu1  ;;  %v1557_v44 = vpop.f32.mrf.mxu0  ;;  %3149 = vmatpush3.msra.mxu0 %v2721_v47  ;;  %s2835_s6 = sshll.u32 %s3188_s2, 4  ;;  %s2836_s6 = int_to_ptr.vmem [resolvable:$true] %s2835_s6 }
 0x220   :  { %v2626_v50 = vrot.slane %v2619_v42, %v3254_v16  ;;  %v1488_v52 = vsub.f32 %v719_v21, %v1327_v40  ;;  %v2634_v60 = vrot.slane %v2627_v51, %v3254_v16  ;;  %s3160_s7 = scalar_lea.vmem %s2836_s6, 128  ;;  %p3165_p1 = scmp.lt.s32.totalorder %s2836_s6, %s2836_s6 }
 0x221   :  { %v3055_v45 = vpop.f32.mrf.mxu1  ;;  %v3070_v48 = vpop.f32.mrf.mxu0  ;;  %p3161_p0 = scmp.ne.s32.totalorder %s2836_s6, %s3160_s7  ;;  %p3166_p2 = scmp.lt.s32.totalorder %s3160_s7, %s3160_s7 }
 0x222   :  { %v2643_v63 = vcombine.low %v2618_v56, %v2626_v50 }
 0x223   :  { %v1479_v49 = vpop.f32.mrf.mxu1  ;;  %v1697_v54 = vpop.f32.mrf.mxu0  ;;  %p3167_p3 = por %p3166_p2, %p3165_p1 }
 0x224   :  { %v1490_v53 = vsub.f32 %v871_v25, %v1479_v49  ;;  %v2650_v8 = vrot.slane %v2643_v63, %v3256_v17 }
 0x225   :  { %v3065_v55 = vpop.f32.mrf.mxu1  ;;  %v3080_v58 = vpop.f32.mrf.mxu0  ;;  %p3168_p4 = pnand %p3167_p3, %p3161_p0 }
 0x226   :  { %v2635_v57 = vcombine.low %v1488_v52, %v1490_v53 }
 0x227   :  { %v1627_v59 = vpop.f32.mrf.mxu1  ;;  %v1837_v62 = vpop.f32.mrf.mxu0 }
 0x228   :  { %v2642_v61 = vrot.slane %v2635_v57, %v3254_v16 }
 0x229   :  { %v3075_v0 = vpop.f32.mrf.mxu1  ;;  %v3090_v1 = vpop.f32.mrf.mxu0 }
 0x22a   :  { %v2651_v2 = vcombine.low %v2634_v60, %v2642_v61 }
 0x22b   :  { %v1767_v6 = vpop.f32.mrf.mxu1  ;;  %v1977_v7 = vpop.f32.mrf.mxu0 }
 0x22c   :  { %v2658_v4 = vrot.slane %v2651_v2, %v3256_v17 }
 0x22d   :  { %v3085_v5 = vpop.f32.mrf.mxu1  ;;  %v3100_v9 = vpop.f32.mrf.mxu0 }
 0x22e   :  { %v2660_v10 = vcombine.high %v2650_v8, %v2658_v4  ;;  %v2659_v11 = vcombine.low %v2650_v8, %v2658_v4 }
 0x22f   :  { %v1907_v12 = vpop.f32.mrf.mxu1  ;;  %v2117_v13 = vpop.f32.mrf.mxu0 }
 0x230   :  { %2713 = vrot.lane.b32.xlu1 %v2660_v10, %s3187_s4  ;;  %v2118_v34 = vadd.f32 %v2117_v13, %v1557_v44 }
 0x231   :  { %v3095_v14 = vpop.f32.mrf.mxu1  ;;  %v3110_v15 = vpop.f32.mrf.mxu0 }
 0x233   :  { %v2047_v18 = vpop.f32.mrf.mxu1  ;;  %v2257_v19 = vpop.f32.mrf.mxu0 }
 0x234   :  { %v2258_v30 = vadd.f32 %v2257_v19, %v1697_v54 }
 0x235   :  { %v3105_v20 = vpop.f32.mrf.mxu1  ;;  %v3120_v21 = vpop.f32.mrf.mxu0 }
 0x236   :  { %v2661_v38 = vcombine.low %v2118_v34, %v2258_v30 }
 0x237   :  { %v2187_v22 = vpop.f32.mrf.mxu1  ;;  %v2397_v23 = vpop.f32.mrf.mxu0 }
 0x238   :  { %v2188_v31 = vadd.f32 %v2187_v22, %v1627_v59  ;;  %v2398_v39 = vadd.f32 %v2397_v23, %v1837_v62  ;;  %v2668_v48 = vrot.slane %v2661_v38, %v3254_v16 }
 0x239   :  { %v3115_v24 = vpop.f32.mrf.mxu1  ;;  %v3130_v25 = vpop.f32.mrf.mxu0 }
 0x23b   :  { %v2327_v26 = vpop.f32.mrf.mxu1  ;;  %v2537_v28 = vpop.f32.mrf.mxu0 }
 0x23c   :  { %v2328_v27 = vadd.f32 %v2327_v26, %v1767_v6  ;;  %v2538_v36 = vadd.f32 %v2537_v28, %v1977_v7 }
 0x23d   :  { %v3125_v29 = vpop.f32.mrf.mxu1  ;;  %v3140_v32 = vpop.f32.mrf.mxu0 }
 0x23e   :  { %v2669_v35 = vcombine.low %v2188_v31, %v2328_v27  ;;  %v2677_v42 = vcombine.low %v2398_v39, %v2538_v36 }
 0x23f   :  { %v2467_v33 = vpop.f32.mrf.mxu1 }
 0x240   :  { %v2676_v41 = vrot.slane %v2669_v35, %v3254_v16  ;;  %v2468_v43 = vadd.f32 %v2467_v33, %v1907_v12  ;;  %v2684_v51 = vrot.slane %v2677_v42, %v3254_v16 }
 0x241   :  { %v3135_v37 = vpop.f32.mrf.mxu1 }
 0x242   :  { %v2693_v50 = vcombine.low %v2668_v48, %v2676_v41 }
 0x243   :  { %v2607_v40 = vpop.f32.mrf.mxu1 }
 0x244   :  { %v2608_v45 = vadd.f32 %v2607_v40, %v2047_v18  ;;  %v2700_v54 = vrot.slane %v2693_v50, %v3256_v17 }
 0x245   :  { %v3145_v44 = vpop.f32.mrf.mxu1 }
 0x246   :  { %v2685_v49 = vcombine.low %v2468_v43, %v2608_v45 }
 0x248   :  { %v2692_v52 = vrot.slane %v2685_v49, %v3254_v16 }
 0x24a   :  { %v2701_v53 = vcombine.low %v2684_v51, %v2692_v52 }
 0x24c   :  { %v2708_v55 = vrot.slane %v2701_v53, %v3256_v17 }
 0x24e   :  { %v2710_v56 = vcombine.high %v2700_v54, %v2708_v55  ;;  %v2709_v57 = vcombine.low %v2700_v54, %v2708_v55 }
 0x250   :  { %2715 = vrot.lane.b32.xlu1 %v2710_v56, %s3187_s4 }
 0x2a2   :  { %v2714_v58 = vpop.permute.xlu1 %2713 }
 0x2a3   :  { %v2719_v59 = vsel %vm265_vm3, %v2659_v11, %v2714_v58 }
 0x2a4   :  { %2723 = vxpose.xlu0.b32.start [1/2] (short) (narrow) %v2719_v59, 8 }
 0x2c2   :  { %v2716_v3 = vpop.permute.xlu1 %2715 }
 0x2c3   :  { %v2720_v60 = vsel %vm265_vm3, %v2709_v57, %v2716_v3 }
 0x2c4   :  { %2724 = vxpose.xlu0.b32.end [2/2] (short) (narrow) %v2720_v60, 8 }
 0x33c   :  { %v2739_v61 = vpop.trf.xlu0 }
 0x33d   :  { %3151 = vmatmul.mubr.msk.f32.vlgmr.msra.gmra.mxu0 %vm24_vm0, %v2739_v61 }
 0x3fd   :  { %v2824_v16 = vpop.f32.mrf.mxu0 }
 0x3fe   :  { %2828 = vst [vmem:[#allocation2] sm:$0xff] %v2824_v16 }
 0x3ff   :  { %v3152_v17 = vpop.f32.mrf.mxu0 }
 0x400   :  { %3171 = shalt.err (!%p3168_p4)
}
 0x401   :  { %2838 = dma.vmem_to_hbm [thread:$0]  %s2836_s6, 128, %s3607_s5, [#allocation3]  }
 0x402   :  { %3180 = dma.done.wait [#allocation3], 128  }
 0x403   :  { %3181 = vsyncadd [#allocation3], 4294967168 }
 0x404   :  { %2842 = vsyncpa [#allocation3], 1 }

</bundles_post_ra>
